<compile_context>
chip_gen: v7x
topology: tpu7x:2x2x1
jax: 0.10.0
libtpu: 0.0.40
codegen_flags: <defaults>
</compile_context>

<pallas_src>
import jax
import jax.numpy as jnp
from jax.experimental import pallas as pl
from jax.experimental.pallas import tpu as pltpu


_LANE_CAP = 32768            # max lane (last-dim) tile width, in elements
_MIN_GRID_STEPS = 8          # keep enough parallel steps for megacore / pipeline overlap
_MIN_PALLAS_BYTES = 1 << 20  # below this, a fused XLA expression beats a kernel launch


def _cdiv(a, b):
    return -(-a // b)


def _sublane_unit(dtype):
    itemsize = jnp.dtype(dtype).itemsize
    if itemsize >= 4:
        return 8
    if itemsize == 2:
        return 16
    return 32


def _largest_divisor_multiple(n, unit, cap):
    """Largest d such that d divides n, d % unit == 0 and d <= cap (None if none)."""
    best = None
    cap = min(n, cap)
    d = unit
    while d <= cap:
        if n % d == 0:
            best = d
        d += unit
    return best


def _vmem_budget():
    """Return (input_tile_bytes, vmem_limit_bytes) sized from the chip's physical VMEM."""
    cap = None
    try:
        cap = getattr(pltpu.get_tpu_info(), "vmem_capacity_bytes", None)
    except Exception:
        cap = None
    if not cap or cap <= 0:
        cap = 64 << 20  # conservative default: v7x per-TC VMEM
    # Per-step working set ~= 2 buffers x (input tile + 2x output tile) = 6x input tile.
    tile = min(8 << 20, cap // 10)                      # ~8 MiB (v5e/v6e), ~6.4 MiB (v7x)
    limit = min((cap * 3) // 4, 6 * tile + (16 << 20))  # ~64 MiB (v5e/v6e), ~48 MiB (v7x)
    limit = max(limit, 32 << 20)
    return int(tile), int(limit)


def _pick_tiling(N, M, dtype, tile_budget):
    """Factor the flattened per-image length M into (R, L) and pick (r_tile, l_tile)."""
    itemsize = jnp.dtype(dtype).itemsize
    unit = _sublane_unit(dtype)

    if M % 128 == 0:
        # Lane-aligned factorization: L is a 128-multiple divisor; full lane per block.
        L = _largest_divisor_multiple(M, 128, min(M, _LANE_CAP)) or M
        R = M // L
        l_tile = L
        if R <= unit:
            r_tile = R  # full (small) sublane dim: always legal
        else:
            row_bytes = L * itemsize
            budget_rows = max(unit, (tile_budget // row_bytes) // unit * unit)
            r_tile = max(unit, min(budget_rows, (R // unit) * unit))
            # Keep enough grid steps for megacore sharding / pipeline overlap (v7x).
            while N * _cdiv(R, r_tile) < _MIN_GRID_STEPS:
                nxt = max(unit, ((r_tile // 2) // unit) * unit)
                if nxt == r_tile:
                    break
                r_tile = nxt
    else:
        # No 128-multiple factorization: stream each image as one padded lane row.
        R, r_tile = 1, 1
        L = M
        l_tile = max(128, min(_LANE_CAP, tile_budget // itemsize) // 128 * 128)
        if l_tile >= M:
            l_tile = M  # full lane dim: legal even if not 128-aligned
    return R, L, r_tile, l_tile


def _crelu_kernel(x_ref, o_ref):
    # x_ref: (1, r_tile, l_tile)   o_ref: (1, 2, r_tile, l_tile)
    x = x_ref[0]
    zero = jnp.zeros((), dtype=x.dtype)
    o_ref[0, 0] = jnp.maximum(x, zero)    # relu(x)
    o_ref[0, 1] = jnp.maximum(-x, zero)   # relu(-x)


def crelu_pallas(x):
    """CReLU via Pallas for NCHW input: returns (N, 2C, H, W)."""
    N, C, H, W = x.shape
    M = C * H * W
    tile_budget, vmem_limit = _vmem_budget()
    R, L, r_tile, l_tile = _pick_tiling(N, M, x.dtype, tile_budget)

    x3 = x.reshape(N, R, L)  # pure contiguous view of the per-image data
    grid = (N, _cdiv(R, r_tile), _cdiv(L, l_tile))

    out = pl.pallas_call(
        _crelu_kernel,
        out_shape=jax.ShapeDtypeStruct((N, 2, R, L), x.dtype),
        grid_spec=pltpu.PrefetchScalarGridSpec(
            num_scalar_prefetch=0,
            grid=grid,
            in_specs=[
                pl.BlockSpec((1, r_tile, l_tile), lambda n, ri, li: (n, ri, li)),
            ],
            out_specs=pl.BlockSpec(
                (1, 2, r_tile, l_tile), lambda n, ri, li: (n, 0, ri, li)
            ),
        ),
        compiler_params=pltpu.CompilerParams(
            dimension_semantics=("parallel", "parallel", "parallel"),
            vmem_limit_bytes=vmem_limit,
        ),
    )(x3)

    # (N, 2, R, L) is contiguous in exactly the channel-concat element order.
    return out.reshape(N, 2 * C, H, W)


def crelu(x, force_pallas=False):
    """CReLU dispatcher: fused XLA for tiny tensors, Pallas kernel otherwise."""
    # TODO(synk): the PyTorch `inplace` flag has no JAX equivalent (immutable arrays).
    nbytes = x.size * jnp.dtype(x.dtype).itemsize
    if not force_pallas and nbytes < _MIN_PALLAS_BYTES:
        return jnp.concatenate([jnp.maximum(x, 0.0), jnp.maximum(-x, 0.0)], axis=1)
    return crelu_pallas(x)


if __name__ == "__main__":
    key = jax.random.PRNGKey(0)
    x = jax.random.normal(key, (2, 4, 16, 16), dtype=jnp.float32)

    # Force the Pallas path so the kernel itself is exercised even at test scale.
    y = crelu(x, force_pallas=True)
    jax.block_until_ready(y)

    # Reference check against the fused XLA expression.
    y_ref = jnp.concatenate([jnp.maximum(x, 0.0), jnp.maximum(-x, 0.0)], axis=1)
    assert y.shape == (2, 8, 16, 16), y.shape
    assert jnp.allclose(y, y_ref), "mismatch vs reference"

    # Dispatcher (small-input fallback) also matches.
    y2 = crelu(x)
    assert jnp.allclose(y2, y_ref), "dispatcher mismatch vs reference"

    print("KERNEL_OK")
</pallas_src>

<mosaic_0001>
module attributes {stable_mosaic.version = 11 : i64} {
  func.func @_crelu_kernel(%arg0: i32, %arg1: i32, %arg2: i32, %arg3: memref<1x1x1024xf32, #tpu.memory_space<vmem>>, %arg4: memref<1x2x1x1024xf32, #tpu.memory_space<vmem>>) attributes {dimension_semantics = [#tpu.dimension_semantics<parallel>, #tpu.dimension_semantics<parallel>, #tpu.dimension_semantics<parallel>], iteration_bounds = array<i64: 2, 1, 1>, scalar_prefetch = 0 : i64, scratch_operands = 0 : i64, tpu.core_type = #tpu.core_type<tc>, window_params = [{transform_indices = @transform_0, window_bounds = array<i64: 1, 1, 1024>}, {transform_indices = @transform_1, window_bounds = array<i64: 1, 2, 1, 1024>}]} {
    %c0 = arith.constant 0 : index
    %c0_0 = arith.constant 0 : index
    %c0_1 = arith.constant 0 : index
    %0 = vector.load %arg3[%c0, %c0_0, %c0_1] : memref<1x1x1024xf32, #tpu.memory_space<vmem>>, vector<1x1x1024xf32>
    %1 = vector.shape_cast %0 : vector<1x1x1024xf32> to vector<1x1024xf32>
    %cst = arith.constant 0.000000e+00 : f32
    %2 = vector.broadcast %cst : f32 to vector<1x1024xf32>
    %3 = arith.maximumf %1, %2 : vector<1x1024xf32>
    %c0_2 = arith.constant 0 : index
    %c0_3 = arith.constant 0 : index
    %c0_4 = arith.constant 0 : index
    %c0_5 = arith.constant 0 : index
    %4 = vector.load %arg4[%c0_2, %c0_3, %c0_4, %c0_5] : memref<1x2x1x1024xf32, #tpu.memory_space<vmem>>, vector<1x1x1x1024xf32>
    %5 = vector.shape_cast %4 : vector<1x1x1x1024xf32> to vector<1x1024xf32>
    %6 = vector.shape_cast %3 : vector<1x1024xf32> to vector<1x1x1x1024xf32>
    tpu.vector_store %arg4[%c0_2, %c0_3, %c0_4, %c0_5], %6 {strides = array<i32>} : memref<1x2x1x1024xf32, #tpu.memory_space<vmem>>, vector<1x1x1x1024xf32>,
    %cst_6 = arith.constant 0.000000e+00 : f32
    %7 = vector.broadcast %cst_6 : f32 to vector<1x1024xf32>
    %8 = arith.subf %7, %1 : vector<1x1024xf32>
    %cst_7 = arith.constant 0.000000e+00 : f32
    %9 = vector.broadcast %cst_7 : f32 to vector<1x1024xf32>
    %10 = arith.maximumf %8, %9 : vector<1x1024xf32>
    %c0_8 = arith.constant 0 : index
    %c1 = arith.constant 1 : index
    %c0_9 = arith.constant 0 : index
    %c0_10 = arith.constant 0 : index
    %11 = vector.load %arg4[%c0_8, %c1, %c0_9, %c0_10] : memref<1x2x1x1024xf32, #tpu.memory_space<vmem>>, vector<1x1x1x1024xf32>
    %12 = vector.shape_cast %11 : vector<1x1x1x1024xf32> to vector<1x1024xf32>
    %13 = vector.shape_cast %10 : vector<1x1024xf32> to vector<1x1x1x1024xf32>
    tpu.vector_store %arg4[%c0_8, %c1, %c0_9, %c0_10], %13 {strides = array<i32>} : memref<1x2x1x1024xf32, #tpu.memory_space<vmem>>, vector<1x1x1x1024xf32>,
    return
  }
  func.func @transform_0(%arg0: i32, %arg1: i32, %arg2: i32) -> (i32, i32, i32) {
    %c0_i32 = arith.constant 0 : i32
    return %arg0, %arg1, %arg2 : i32, i32, i32
  }
  func.func @transform_1(%arg0: i32, %arg1: i32, %arg2: i32) -> (i32, i32, i32, i32) {
    %c0_i32 = arith.constant 0 : i32
    %c0_i32_0 = arith.constant 0 : i32
    return %arg0, %c0_i32, %arg1, %arg2 : i32, i32, i32, i32
  }
}

</mosaic_0001>

<bundles_post_ra>
// kernel: tpu_custom_call.1
= control target key start
LH: loop header
LB: loop body
LE: loop exit
PB: predicated region body
PF: predicated region fallthrough
CT: control target
= control target key end

     0   :  { %6 = vsyncpa [#allocation3], 0  ;;  %s670_s0 = inlined_call_operand.hbm [shape: f32[2,1,1024], index: 0, kind: input, shape index: {}]   ;;  %s671_s1 = inlined_call_operand.hbm [shape: f32[2,2,1,1024], index: 1, kind: output, shape index: {}]  }
   0x1   :  { %8 = vsyncpa [#allocation3 + $0x1], 0 }
   0x2   :  { %9 = vsyncpa [#allocation4], 0 }
   0x3   :  { %11 = vsyncpa [#allocation4 + $0x1], 0  ;;  %s495_s6 = smov 0   ;;  %s497_s7 = smov 0  }
   0x4   :  { %s499_s8 = smov 0   ;;  %s501_s9 = smov 0  }
   0x5   :  { %s503_s10 = smov 0   ;;  %s505_s11 = smov 0  }
   0x6 LB: > { %s285_s12 = sadd.s32 4294967295, %s479_s11   ;;  %s286_s13 = sadd.s32 4294967294, %s479_s11   ;;  %s479_s11 = sphi %s505_s11, %s17_s11   ;;  %s475_s10 = sphi %s503_s10, %s687_s10   ;;  %s471_s9 = sphi %s501_s9, %s686_s9   ;;  %s467_s8 = sphi %s499_s8, %s685_s8   ;;  %s463_s7 = sphi %s497_s7, %s684_s7   ;;  %s459_s6 = sphi %s495_s6, %s683_s6  }
   0x7   : > { %s36_s14 = sadd.s32 1, %s475_s10  ;;  %s47_s15 = sadd.s32 1, %s467_s8 }
   0x8   : > { %p38_p0 = scmp.ge.s32.totalorder %s36_s14, 2  ;;  %p54_p1 = scmp.ne.s32.totalorder %s467_s8, %s463_s7 }
   0x9   : > { %p55_p2 = scmp.eq.s32.totalorder %s479_s11, 0  ;;  %p60_p3 = scmp.ne.s32.totalorder %s463_s7, %s459_s6 }
   0xa   : > { %s689_s14 = smov (%p38_p0, %s36_s14), 0  ;;  %p61_p5 = scmp.eq.s32.totalorder %s285_s12, 0 }
   0xb   : > { %p536_p4 = por %p55_p2, %p54_p1  ;;  %s40_s17 = ssub.s32 %s475_s10, %s689_s14 }
   0xc   : > { %p88_p6 = scmp.eq.s32.totalorder %s285_s12, 1  ;;  %p45_p7 = scmp.eq.s32.totalorder %s40_s17, 0 }
   0xd   : > { %p542_p8 = por %p61_p5, %p60_p3  ;;  %p94_p10 = scmp.eq.s32.totalorder %s286_s13, 1 }
   0xe   : > { %p546_p9 = por %p88_p6, %p54_p1  ;;  %p315_p13 = scmp.lt.s32.totalorder %s479_s11, 2 }
   0xf   : > { %s551_s20 = scalar_select %p45_p7, %s467_s8, %s47_s15  }
  0x10   : > { %s675_s19 = scalar_select %p546_p9, 1, 0 }
  0x11   : > { %p553_p11 = por %p94_p10, %p60_p3  ;;  %s114_s22 = sand.u32 1, %s467_s8  }
  0x12   : > { %s289_s23 = sshll.u32 %s114_s22, 3  ;;  %s301_s24 = sshll.u32 %s475_s10, 7 }
  0x13   : > { %s676_s21 = scalar_select %p553_p11, 1, 0 }
  0x14   : > { %s564_s27 = scalar_lea.hbm %s670_s0, %s301_s24  ;;  %s118_s28 = scalar_lea.vmem [#allocation2], %s289_s23 }
  0x15   : > { %s130_s29 = sshll.u32 %s118_s28, 4  ;;  %p570_p0 = pnand %p315_p13, %p536_p4  ;;  %s566_s29 = int_to_ptr.vmem [resolvable:$true] %s130_s29 }
  0x16   : > { %s115_s2 = scalar_lea.sflag [#allocation3], %s114_s22  ;;  %s367_s3 = scalar_lea.hbm %s564_s27, 128 }
  0x17   : > { %p368_p3 = scmp.ne.s32.totalorder %s564_s27, %s367_s3  ;;  %p369_p5 = pneg %p570_p0 }
  0x18   : > { %s372_s12 = scalar_lea.hbm %s670_s0, 256  ;;  %p373_p4 = scmp.lt.u32.totalorder %s564_s27, %s670_s0 }
  0x19   : > { %p370_p6 = pnand %p369_p5, %p368_p3  ;;  %p374_p10 = scmp.lt.u32.totalorder %s372_s12, %s367_s3 }
  0x1a   : > { %p376_p12 = scmp.lt.u32.totalorder %s367_s3, %s564_s27 }
  0x1b   : > { %p371_p7 = pneg %p370_p6  ;;  %p375_p13 = por %p374_p10, %p373_p4 }
  0x1d   : > { %p377_p1 = por %p376_p12, %p375_p13 }
  0x1f   : > { %p378_p2 = pnand %p377_p1, %p371_p7 }
  0x21   : > { %381 = shalt.err (!%p378_p2)
}
  0x22   : > { %s382_s16 = scalar_lea.vmem %s566_s29, 128  ;;  %s481_s17 = smov [#allocation2]  }
  0x23   : > { %p383_p3 = scmp.ne.s32.totalorder %s566_s29, %s382_s16  ;;  %s387_s22 = sshll.u32 %s481_s17, 4  ;;  %s388_s22 = int_to_ptr.vmem [resolvable:$false] %s387_s22 }
  0x24   : > { %s389_s23 = scalar_lea.vmem %s388_s22, 256  ;;  %p390_p9 = scmp.lt.s32.totalorder %s566_s29, %s388_s22 }
  0x25   : > { %p385_p6 = pnand %p383_p3, %p369_p5  ;;  %p391_p4 = scmp.lt.s32.totalorder %s389_s23, %s382_s16 }
  0x27   : > { %p386_p11 = pneg %p385_p6  ;;  %p392_p10 = por %p391_p4, %p390_p9 }
  0x29   : > { %p393_p12 = pnand %p392_p10, %p386_p11 }
  0x2b   : > { %396 = shalt.err (!%p393_p12)
}
  0x2c   : > { %310 = dma.hbm_to_vmem [thread:$0]  (!%p570_p0), %s564_s27, 128, %s566_s29, %s115_s2  }
  0x2d   : > { %p678_p1 = scmp.lt.s32.totalorder %s479_s11, 3  ;;  %p679_p2 = scmp.ge.s32.totalorder %s479_s11, 1 }
  0x2f   : > { %p136_p5 = pnand %p679_p2, %p678_p1 }
  0x30   : > { %s606_s24 = sand.u32 (!%p136_p5), 1, %s463_s7  }
  0x31   : > { %139 = sbr.rel (%p136_p5) target bundleno = 84 (0x54), region = 24  ;;  %s293_s25 = sshll.u32 (!%p136_p5), %s606_s24, 3 }
  0x32   : > { %s142_s26 = scalar_lea.sflag (!%p136_p5), [#allocation3], %s606_s24  ;;  %s145_s28 = scalar_lea.vmem (!%p136_p5), [#allocation2], %s293_s25 }
  0x38   : > { %450 = dma.done.wait (%p542_p8), %s142_s26, 128  }
  0x39   : > { %452 = vsyncadd (%p542_p8), %s142_s26, 4294967168  ;;  %s294_s27 = sshll.u32 %s606_s24, 4  ;;  %s302_s2 = sshll.u32 %s471_s9, 8  ;;  %v166_v0 = vld [vmem:[%s145_s28] sm:$0xff] }
  0x3a   : > { %s163_s29 = scalar_lea.vmem [#allocation5], %s294_s27  ;;  %v167_v1 = vmax.f32 %v166_v0, 0.0  ;;  %v169_v2 = vsub.f32 0.0, %v166_v0  ;;  %s621_s18 = scalar_lea.hbm %s671_s1, %s302_s2 }
  0x3b   : > { %s191_s30 = sshll.u32 %s163_s29, 4  ;;  %s174_s5 = scalar_lea.sflag [#allocation4], %s606_s24  ;;  %s616_s30 = int_to_ptr.vmem [resolvable:$true] %s191_s30 }
  0x3c   : > { %168 = vst [vmem:[%s163_s29] sm:$0xff] %v167_v1  ;;  %v170_v3 = vmax.f32 %v169_v2, 0.0  ;;  %s397_s12 = scalar_lea.vmem %s616_s30, 256  ;;  %p680_p9 = scmp.ne.s32.totalorder %s675_s19, 0 }
  0x3d   : > { %p398_p8 = scmp.ne.s32.totalorder %s616_s30, %s397_s12  ;;  %s482_s9 = smov [#allocation5]  }
  0x3e   : > { %295 = vst [vmem:[%s163_s29 + $0x8] sm:$0xff] %v170_v3  ;;  %s401_s13 = sshll.u32 %s482_s9, 4  ;;  %s402_s13 = int_to_ptr.vmem [resolvable:$false] %s401_s13 }
  0x3f   : > { %p399_p11 = pnand %p398_p8, %p680_p9  ;;  %s403_s15 = scalar_lea.vmem %s402_s13, 512 }
  0x40   : > { %p404_p7 = scmp.lt.s32.totalorder %s616_s30, %s402_s13  ;;  %p405_p13 = scmp.lt.s32.totalorder %s403_s15, %s397_s12 }
  0x41   : > { %p400_p0 = pneg %p399_p11 }
  0x42   : > { %p406_p3 = por %p405_p13, %p404_p7 }
  0x44   : > { %p407_p6 = pnand %p406_p3, %p400_p0 }
  0x46   : > { %410 = shalt.err (!%p407_p6)
}
  0x47   : > { %s411_s16 = scalar_lea.hbm %s621_s18, 256  ;;  %s415_s23 = scalar_lea.hbm %s671_s1, 512 }
  0x48   : > { %p412_p4 = scmp.ne.s32.totalorder %s621_s18, %s411_s16  ;;  %p416_p1 = scmp.lt.u32.totalorder %s621_s18, %s671_s1 }
  0x49   : > { %p417_p2 = scmp.lt.u32.totalorder %s415_s23, %s411_s16  ;;  %p419_p8 = scmp.lt.u32.totalorder %s411_s16, %s621_s18 }
  0x4a   : > { %p413_p10 = pnand %p412_p4, %p680_p9 }
  0x4b   : > { %p418_p5 = por %p417_p2, %p416_p1 }
  0x4c   : > { %p414_p12 = pneg %p413_p10 }
  0x4d   : > { %p420_p11 = por %p419_p8, %p418_p5 }
  0x4f   : > { %p421_p0 = pnand %p420_p11, %p414_p12 }
  0x51   : > { %424 = shalt.err (!%p421_p0)
}
  0x52   : > { %s483_s28 = smov 128   ;;  %s484_s27 = smov 8  }
  0x53   : > { %305 = dma.vmem_to_hbm [thread:$0]  (%p680_p9), %s616_s30, 256, %s621_s18, %s174_s5, %s483_s28, %s483_s28, %s484_s27  }
  0x54 PF: > { %s206_s29 = sand.u32 1, %s459_s6   ;;  %p681_p7 = scmp.ne.s32.totalorder %s676_s21, 0 }
  0x55   : > { %p682_p13 = scmp.ge.s32.totalorder %s479_s11, 2  ;;  %s207_s2 = scalar_lea.sflag [#allocation4], %s206_s29 }
  0x57   : > { %p312_p3 = pnand %p682_p13, %p681_p7 }
  0x59   : > { %454 = dma.done.wait (!%p312_p3), %s207_s2, 256  }
  0x5a   : > { %456 = vsyncadd (!%p312_p3), %s207_s2, 4294967040  ;;  %s17_s11 = sadd.s32 1, %s479_s11   ;;  %s683_s6 = smov %s463_s7 }
  0x5b   : > { %p14_p6 = scmp.ge.s32.totalorder %s17_s11, 4   ;;  %s684_s7 = smov %s467_s8 }
  0x5c   : > { %s685_s8 = smov %s551_s20  ;;  %s686_s9 = smov %s475_s10 }
  0x5d   : > { %s687_s10 = smov %s689_s14  ;;  %16 = sbr.rel (!%p14_p6) target bundleno = 6 (0x6), region = 70 }
  0x64   :  { %212 = vsyncpa [#allocation3], 1 }
  0x65   :  { %214 = vsyncpa [#allocation3 + $0x1], 1 }
  0x66   :  { %215 = vsyncpa [#allocation4], 1 }
  0x67   :  { %217 = vsyncpa [#allocation4 + $0x1], 1 }

</bundles_post_ra>
